<compile_context>
chip_gen: v5e
topology: v5e:2x2
jax: 0.10.0
libtpu: 0.0.40
codegen_flags: <defaults>
</compile_context>

<pallas_src>
import functools

import jax
import jax.numpy as jnp
import numpy as np
from jax.experimental import pallas as pl
from jax.experimental.pallas import tpu as pltpu


_DEFAULT_NODE_TILE = 512  # node rows streamed per grid step (feedback: 256-1024)


def _round_up(x, m):
    return ((x + m - 1) // m) * m


# ------------------------ segment readout (max/min/mean) ---------------------

def _make_segment_readout_kernel(op, tile):
    """One compact-schedule step: reduce the valid rows of one flat-table tile
    into the current graph's VMEM accumulator."""

    def kernel(counts_ref, offs_ref, gid_ref, blk_ref, first_ref, last_ref,
               x_ref, out_ref, acc_ref):
        s = pl.program_id(0)
        g = gid_ref[s]
        blk = blk_ref[s]

        @pl.when(first_ref[s] == 1)
        def _():
            if op == "max":
                acc_ref[...] = jnp.full_like(acc_ref, -jnp.inf)
            elif op == "min":
                acc_ref[...] = jnp.full_like(acc_ref, jnp.inf)
            else:  # mean
                acc_ref[...] = jnp.zeros_like(acc_ref)

        # (tile, D) aligned window of the flat node table; upcast once (v5e has
        # no bf16 VPU path, accumulation is f32 everywhere).
        x = x_ref[...].astype(jnp.float32)
        row = blk * tile + jax.lax.broadcasted_iota(jnp.int32, (tile, 1), 0)
        start = offs_ref[g]
        cnt = counts_ref[g]
        valid = (row >= start) & (row < start + cnt)   # masks neighbor graphs
                                                       # and the ragged tail

        if op == "max":
            xm = jnp.where(valid, x, -jnp.inf)
            acc_ref[...] = jnp.maximum(acc_ref[...], xm.max(axis=0, keepdims=True))
        elif op == "min":
            xm = jnp.where(valid, x, jnp.inf)
            acc_ref[...] = jnp.minimum(acc_ref[...], xm.min(axis=0, keepdims=True))
        else:  # mean
            xm = jnp.where(valid, x, 0.0)
            acc_ref[...] = acc_ref[...] + xm.sum(axis=0, keepdims=True)

        @pl.when(last_ref[s] == 1)
        def _():
            if op == "mean":
                denom = jnp.maximum(counts_ref[g].astype(jnp.float32), 1.0)
                out_ref[0] = (acc_ref[...] / denom).astype(out_ref.dtype)
            else:
                out_ref[0] = acc_ref[...].astype(out_ref.dtype)

    return kernel


def segment_readout(node_emb, batch_num_nodes, op, *,
                    node_tile=_DEFAULT_NODE_TILE,
                    max_graphs=None, max_steps=None):
    """dgl.readout_nodes equivalent: per-graph max/min/mean over node rows.

    node_emb: (N, D), nodes ordered graph-by-graph (DGL batched order).
    batch_num_nodes: concrete python sequence of per-graph node counts.
    max_graphs / max_steps: optional static upper bounds; padding the schedule
    to them keeps the grid shape (and the compile) stable across batches.
    """
    counts = np.asarray(batch_num_nodes, dtype=np.int32)
    num_graphs = int(counts.shape[0])
    n_total, dim = node_emb.shape
    assert int(counts.sum()) == n_total

    # Tile: large enough to amortize the ~0.35us/step pipeline overhead, small
    # enough that aligned-block over-fetch at unaligned graph boundaries stays
    # bounded (~<=2x).  16-row alignment keeps bf16 sublane packing happy.
    mean_cnt = max(int(counts.mean()), 1)
    tile = int(min(node_tile, _round_up(n_total, 16),
                   max(16, _round_up(mean_cnt, 16))))
    n_flat_tiles = pl.cdiv(n_total, tile)

    # Compact real-tile schedule (host-side index bookkeeping only; the node
    # table itself is never copied / padded / packed).
    offs = np.zeros(num_graphs, np.int32)
    offs[1:] = np.cumsum(counts)[:-1]
    gid, blk, first, last = [], [], [], []
    for g in range(num_graphs):
        c, o = int(counts[g]), int(offs[g])
        if c == 0:
            # TODO(synk): dgl.readout_nodes on a 0-node graph is ill-defined for
            # max/min; we emit one fully-masked step (row stays at the sentinel).
            b0 = b1 = min(o // tile, n_flat_tiles - 1)
        else:
            b0, b1 = o // tile, (o + c - 1) // tile
        for b in range(b0, b1 + 1):
            gid.append(g)
            blk.append(b)
            first.append(1 if b == b0 else 0)
            last.append(1 if b == b1 else 0)
    n_steps = len(gid)

    out_graphs = num_graphs
    if max_graphs is not None:
        assert max_graphs >= num_graphs
        counts = np.pad(counts, (0, max_graphs - num_graphs))
        offs = np.pad(offs, (0, max_graphs - num_graphs), constant_values=n_total)
        out_graphs = max_graphs
    if max_steps is not None:
        assert max_steps >= n_steps
        pad = max_steps - n_steps
        # Padded steps replay the last real block with first/last = 0, so they
        # neither write the output nor disturb a live accumulation.
        gid += [gid[-1]] * pad
        blk += [blk[-1]] * pad
        first += [0] * pad
        last += [0] * pad
        n_steps = max_steps

    out = pl.pallas_call(
        _make_segment_readout_kernel(op, tile),
        out_shape=jax.ShapeDtypeStruct((out_graphs, 1, dim), jnp.float32),
        grid_spec=pltpu.PrefetchScalarGridSpec(
            num_scalar_prefetch=6,
            grid=(n_steps,),
            in_specs=[pl.BlockSpec((tile, dim),
                                   lambda s, c, o, g, b, f, l: (b[s], 0))],
            out_specs=pl.BlockSpec((1, 1, dim),
                                   lambda s, c, o, g, b, f, l: (g[s], 0, 0)),
            scratch_shapes=[pltpu.VMEM((1, dim), jnp.float32)],
        ),
        compiler_params=pltpu.CompilerParams(
            # Consecutive steps of one graph share the accumulator, so the
            # compact 1-D schedule is "arbitrary".
            dimension_semantics=("arbitrary",)),
    )(jnp.asarray(counts), jnp.asarray(offs),
      jnp.asarray(np.asarray(gid, np.int32)),
      jnp.asarray(np.asarray(blk, np.int32)),
      jnp.asarray(np.asarray(first, np.int32)),
      jnp.asarray(np.asarray(last, np.int32)),
      node_emb)
    return out[:num_graphs, 0, :]


# ------------------------------ weighted_sum ----------------------------------

def _weighted_sum_kernel(x_ref, wg_ref, bg_ref, wpt_ref, bp_ref, out_ref, acc_ref,
                         *, tile, tiles_per_core, n_valid):
    c = pl.program_id(0)   # 2-way node-range split ("parallel" -> both v7x TCs)
    t = pl.program_id(1)

    @pl.when(t == 0)
    def _():
        acc_ref[...] = jnp.zeros_like(acc_ref)

    global_tile = c * tiles_per_core + t
    row = global_tile * tile + jax.lax.broadcasted_iota(jnp.int32, (tile, 1), 0)
    valid = row < n_valid

    # Zero padded / clamped rows so no garbage ever reaches the MXU or EUP.
    x = jnp.where(valid, x_ref[...], 0)
    x32 = x.astype(jnp.float32)

    # node_to_graph: x @ Wp^T + bp on the MXU (bf16-native when x/wpt are bf16),
    # f32 accumulate.
    proj = jnp.dot(x.astype(wpt_ref.dtype), wpt_ref[...],
                   preferred_element_type=jnp.float32) + bp_ref[...]
    # node_gating: output width 1 -> VPU multiply + lane reduction (a 1-wide MXU
    # matmul would waste the array); sigmoid lands on the otherwise-idle EUP.
    logit = jnp.sum(x32 * wg_ref[...], axis=-1, keepdims=True) + bg_ref[...]
    gate = jnp.where(valid, jax.nn.sigmoid(logit), 0.0)

    acc_ref[...] = acc_ref[...] + jnp.sum(gate * proj, axis=0, keepdims=True)

    @pl.when(t == tiles_per_core - 1)
    def _():
        out_ref[0] = acc_ref[...]


def weighted_sum_readout(node_emb, wg, bg, wpt, bp, *,
                         node_tile=_DEFAULT_NODE_TILE):
    """(sigmoid(x @ wg^T + bg) * (x @ Wp^T + bp)).sum(0, keepdim=True), fused.

    node_emb may be f32 or bf16 (bf16 halves the HBM stream); accumulation is
    always f32.  No padded copy of node_emb is made — the ragged tail is masked
    in-kernel.
    """
    n_total, dim = node_emb.shape
    gdim = wpt.shape[1]
    tile = int(min(node_tile, _round_up(n_total, 16)))
    n_tiles = pl.cdiv(n_total, tile)
    num_splits = 2                         # leading "parallel" axis (v7x 2 TCs)
    tiles_per_core = pl.cdiv(n_tiles, num_splits)

    def x_map(c, t):
        # Clamp so the (rare) over-hanging step of the second split re-reads the
        # last real block; its rows are >= n_total and fully masked in-kernel.
        return (jnp.minimum(c * tiles_per_core + t, n_tiles - 1), 0)

    kernel = functools.partial(_weighted_sum_kernel, tile=tile,
                               tiles_per_core=tiles_per_core, n_valid=n_total)

    # Weight/bias blocks have constant index maps, so they are DMA'd once and
    # stay VMEM-resident for the whole grid.  wpt is stored pre-transposed and
    # (optionally) bf16, halving the resident footprint; at very large D it can
    # additionally be single-buffered (pipeline_mode=pl.Buffered(1)).
    out = pl.pallas_call(
        kernel,
        out_shape=jax.ShapeDtypeStruct((num_splits, 1, gdim), jnp.float32),
        grid_spec=pltpu.PrefetchScalarGridSpec(
            num_scalar_prefetch=0,
            grid=(num_splits, tiles_per_core),
            in_specs=[
                pl.BlockSpec((tile, dim), x_map),
                pl.BlockSpec((1, dim), lambda c, t: (0, 0)),
                pl.BlockSpec((1, 1), lambda c, t: (0, 0)),
                pl.BlockSpec((dim, gdim), lambda c, t: (0, 0)),
                pl.BlockSpec((1, gdim), lambda c, t: (0, 0)),
            ],
            out_specs=pl.BlockSpec((1, 1, gdim), lambda c, t: (c, 0, 0)),
            scratch_shapes=[pltpu.VMEM((1, gdim), jnp.float32)],
        ),
        compiler_params=pltpu.CompilerParams(
            dimension_semantics=("parallel", "arbitrary")),
    )(node_emb, wg, bg, wpt, bp)
    # Combine the two split-range partial sums (cheap (2, gdim) reduction).
    return out[:, 0, :].sum(axis=0, keepdims=True)


# --------------------------- module-level wrappers ----------------------------

class StaticDynamicCombiner:
    def __init__(self, mode, static_emb_dim, dynamic_emb_dim):
        self.mode = mode
        self.static_emb_dim = static_emb_dim
        self.dynamic_emb_dim = dynamic_emb_dim
        if mode == 'concat':
            self.combined_emb_dim = static_emb_dim + dynamic_emb_dim
        elif mode == 'static_only':
            self.combined_emb_dim = static_emb_dim
        elif mode == 'dynamic_only':
            self.combined_emb_dim = dynamic_emb_dim
        else:
            raise ValueError(f'Invalid combiner mode: {mode}')

    def __call__(self, static_emb, dynamic_emb):
        if self.mode == 'concat':
            return jnp.concatenate([static_emb, dynamic_emb], axis=1)
        elif self.mode == 'static_only':
            return static_emb
        return dynamic_emb


class Combiner:
    # TODO(synk): the RGCN graph-conv branch of Combiner is not exercised by
    # GraphReadout.forward (only the dims are consumed), so it is not built here.
    def __init__(self, static_emb_dim, dynamic_emb_dim,
                 static_dynamic_combine_mode='concat'):
        self.static_emb_dim = static_emb_dim
        self.dynamic_emb_dim = dynamic_emb_dim
        self.static_dynamic_combiner = StaticDynamicCombiner(
            static_dynamic_combine_mode, static_emb_dim, dynamic_emb_dim)

    @property
    def combined_emb_dim(self):
        return self.static_dynamic_combiner.combined_emb_dim


class GraphReadout:
    def __init__(self, key, combiner, readout_op='max', readout_node_type='static',
                 param_dtype=jnp.float32):
        self.combiner = combiner
        self.readout_node_type = readout_node_type
        if readout_node_type == 'combined':
            self.node_emb_dim = combiner.combined_emb_dim
        elif readout_node_type == 'static':
            self.node_emb_dim = combiner.static_emb_dim
        elif readout_node_type == 'dynamic':
            self.node_emb_dim = combiner.dynamic_emb_dim
        else:
            raise ValueError(f'Invalid type: {readout_node_type}')
        self.readout_op = readout_op
        if readout_op in ('max', 'min', 'mean'):
            self.graph_emb_dim = self.node_emb_dim
            self.params = None
        elif readout_op == 'weighted_sum':
            self.graph_emb_dim = 2 * self.node_emb_dim
            d, gd = self.node_emb_dim, self.graph_emb_dim
            kg, kgb, kp, kpb = jax.random.split(key, 4)
            s = 1.0 / float(d) ** 0.5
            # nn.Linear(d, 1) gating and nn.Linear(d, 2d) node_to_graph weights,
            # stored pre-transposed; the big projection weight is stored in
            # param_dtype (bf16 recommended) to halve its resident footprint.
            self.params = dict(
                wg=jax.random.uniform(kg, (1, d), jnp.float32, -s, s),
                bg=jax.random.uniform(kgb, (1, 1), jnp.float32, -s, s),
                wpt=jax.random.uniform(kp, (d, gd), jnp.float32, -s, s
                                       ).astype(param_dtype),
                bp=jax.random.uniform(kpb, (1, gd), jnp.float32, -s, s),
            )
        else:
            raise ValueError(f'Invalid readout: {readout_op}')

    def forward(self, batch_num_nodes, combined, static, dynamic, **readout_kwargs):
        # `batch_num_nodes` stands in for the DGL batched graph G; that is the
        # only structure dgl.readout_nodes needs.
        # TODO(synk): G.local_scope()/G.ndata caching is DGL bookkeeping with no
        # effect on the returned tensor; it is not reproduced.
        emb_dict = {'combined': combined, 'static': static, 'dynamic': dynamic}
        _node_emb_name, node_emb = emb_dict[self.readout_node_type]
        if self.readout_op in ('max', 'min', 'mean'):
            return segment_readout(node_emb, batch_num_nodes, self.readout_op,
                                   **readout_kwargs)
        p = self.params
        return weighted_sum_readout(node_emb, p['wg'], p['bg'], p['wpt'], p['bp'])


# ----------------------------------- main -------------------------------------

if __name__ == "__main__":
    key = jax.random.PRNGKey(0)
    k_static, k_dynamic, k_ws = jax.random.split(key, 3)

    # Lane-dense feature dims (multiples of 128) keep blocks / accumulators /
    # output stores unmasked.
    static_dim, dynamic_dim = 128, 128
    batch_num_nodes = [10, 7, 13]          # batched graph with 3 graphs
    n_nodes = sum(batch_num_nodes)

    static_emb = jax.random.normal(k_static, (n_nodes, static_dim), jnp.float32)
    dynamic_emb = jax.random.normal(k_dynamic, (n_nodes, dynamic_dim), jnp.float32)

    combiner = Combiner(static_dim, dynamic_dim, 'concat')
    combined_emb = combiner.static_dynamic_combiner(static_emb, dynamic_emb)

    combined = ('combined_emb', combined_emb)
    static = ('static_emb', static_emb)
    dynamic = ('dynamic_emb', dynamic_emb)

    # default config of the torch module: readout_op='max', readout_node_type='static'
    readout_max = GraphReadout(key, combiner, readout_op='max',
                               readout_node_type='static')
    out_max = jax.block_until_ready(
        readout_max.forward(batch_num_nodes, combined, static, dynamic))

    readout_min = GraphReadout(key, combiner, readout_op='min',
                               readout_node_type='combined')
    out_min = jax.block_until_ready(
        readout_min.forward(batch_num_nodes, combined, static, dynamic))

    # mean path also exercises the static (max_graphs/max_steps) schedule padding.
    readout_mean = GraphReadout(key, combiner, readout_op='mean',
                                readout_node_type='dynamic')
    out_mean = jax.block_until_ready(
        readout_mean.forward(batch_num_nodes, combined, static, dynamic,
                             max_graphs=4, max_steps=8))

    # weighted_sum streams a bf16 node table + bf16 projection weight (f32 acc).
    combined_bf16 = combined_emb.astype(jnp.bfloat16)
    readout_ws = GraphReadout(k_ws, combiner, readout_op='weighted_sum',
                              readout_node_type='combined',
                              param_dtype=jnp.bfloat16)
    out_ws = jax.block_until_ready(
        readout_ws.forward(batch_num_nodes, ('combined_emb', combined_bf16),
                           static, dynamic))

    # ----------------------------- plain-JAX refs -----------------------------
    offs = np.concatenate([[0], np.cumsum(batch_num_nodes)]).astype(int)
    ref_max = jnp.stack(
        [static_emb[offs[g]:offs[g + 1]].max(axis=0) for g in range(3)])
    ref_min = jnp.stack(
        [combined_emb[offs[g]:offs[g + 1]].min(axis=0) for g in range(3)])
    ref_mean = jnp.stack(
        [dynamic_emb[offs[g]:offs[g + 1]].mean(axis=0) for g in range(3)])

    p = readout_ws.params
    x32 = combined_bf16.astype(jnp.float32)       # same bf16-quantized inputs
    wpt32 = p['wpt'].astype(jnp.float32)
    gate = jax.nn.sigmoid(
        jnp.dot(x32, p['wg'].T, precision=jax.lax.Precision.HIGHEST) + p['bg'])
    proj = jnp.dot(x32, wpt32, precision=jax.lax.Precision.HIGHEST) + p['bp']
    ref_ws = (gate * proj).sum(axis=0, keepdims=True)

    assert out_max.shape == (3, static_dim) and out_max.dtype == jnp.float32
    assert out_min.shape == (3, combiner.combined_emb_dim)
    assert out_mean.shape == (3, dynamic_dim)
    assert out_ws.shape == (1, 2 * combiner.combined_emb_dim)
    assert bool(jnp.all(jnp.isfinite(out_max)))
    assert bool(jnp.all(jnp.isfinite(out_min)))
    assert bool(jnp.all(jnp.isfinite(out_mean)))
    assert bool(jnp.all(jnp.isfinite(out_ws)))
    assert bool(jnp.allclose(out_max, ref_max, atol=1e-6, rtol=1e-6))
    assert bool(jnp.allclose(out_min, ref_min, atol=1e-6, rtol=1e-6))
    assert bool(jnp.allclose(out_mean, ref_mean, atol=1e-5, rtol=1e-5))
    assert bool(jnp.allclose(out_ws, ref_ws, atol=1e-3, rtol=1e-3))
    print("KERNEL_OK")
</pallas_src>

<mosaic_0001>
module attributes {stable_mosaic.version = 11 : i64} {
  func.func @kernel(%arg0: i32, %arg1: memref<3xi32, #tpu.memory_space<smem>>, %arg2: memref<3xi32, #tpu.memory_space<smem>>, %arg3: memref<4xi32, #tpu.memory_space<smem>>, %arg4: memref<4xi32, #tpu.memory_space<smem>>, %arg5: memref<4xi32, #tpu.memory_space<smem>>, %arg6: memref<4xi32, #tpu.memory_space<smem>>, %arg7: memref<16x128xf32, #tpu.memory_space<vmem>>, %arg8: memref<1x1x128xf32, #tpu.memory_space<vmem>>, %arg9: memref<1x128xf32, #tpu.memory_space<vmem>>) attributes {dimension_semantics = [#tpu.dimension_semantics<arbitrary>], iteration_bounds = array<i64: 4>, scalar_prefetch = 6 : i64, scratch_operands = 1 : i64, tpu.core_type = #tpu.core_type<tc>, window_params = [{transform_indices = @transform_0, window_bounds = array<i64: 16, 128>}, {transform_indices = @transform_1, window_bounds = array<i64: 1, 1, 128>}]} {
    %0 = arith.index_cast %arg0 : i32 to index
    %1 = memref.load %arg3[%0] : memref<4xi32, #tpu.memory_space<smem>>
    %2 = arith.index_cast %arg0 : i32 to index
    %3 = memref.load %arg4[%2] : memref<4xi32, #tpu.memory_space<smem>>
    %4 = arith.index_cast %arg0 : i32 to index
    %5 = memref.load %arg5[%4] : memref<4xi32, #tpu.memory_space<smem>>
    %c1_i32 = arith.constant 1 : i32
    %6 = arith.cmpi eq, %5, %c1_i32 : i32
    %7 = arith.extui %6 : i1 to i32
    %c0_i32 = arith.constant 0 : i32
    %8 = arith.cmpi ne, %7, %c0_i32 : i32
    scf.if %8 {
      %cst_8 = arith.constant 0xFF800000 : f32
      %38 = vector.broadcast %cst_8 : f32 to vector<1x128xf32>
      %c0_9 = arith.constant 0 : index
      %c0_10 = arith.constant 0 : index
      %39 = vector.load %arg9[%c0_9, %c0_10] : memref<1x128xf32, #tpu.memory_space<vmem>>, vector<1x128xf32>
      tpu.vector_store %arg9[%c0_9, %c0_10], %38 {strides = array<i32>} : memref<1x128xf32, #tpu.memory_space<vmem>>, vector<1x128xf32>,
    } else {
    }
    %c0 = arith.constant 0 : index
    %c0_0 = arith.constant 0 : index
    %9 = vector.load %arg7[%c0, %c0_0] : memref<16x128xf32, #tpu.memory_space<vmem>>, vector<16x128xf32>
    %c16_i32 = arith.constant 16 : i32
    %10 = arith.muli %3, %c16_i32 : i32
    %11 = tpu.iota {dimensions = array<i32: 0>} : vector<16x1xi32>
    %12 = vector.broadcast %10 : i32 to vector<16x1xi32>
    %13 = arith.addi %12, %11 : vector<16x1xi32>
    %14 = arith.index_cast %1 : i32 to index
    %15 = memref.load %arg2[%14] : memref<3xi32, #tpu.memory_space<smem>>
    %16 = arith.index_cast %1 : i32 to index
    %17 = memref.load %arg1[%16] : memref<3xi32, #tpu.memory_space<smem>>
    %18 = vector.broadcast %15 : i32 to vector<16x1xi32>
    %19 = arith.cmpi sge, %13, %18 : vector<16x1xi32>
    %20 = arith.addi %15, %17 : i32
    %21 = vector.broadcast %20 : i32 to vector<16x1xi32>
    %22 = arith.cmpi slt, %13, %21 : vector<16x1xi32>
    %23 = arith.andi %19, %22 : vector<16x1xi1>
    %cst = arith.constant 0xFF800000 : f32
    %24 = vector.shape_cast %23 : vector<16x1xi1> to vector<16x1xi1>
    %25 = vector.broadcast %24 : vector<16x1xi1> to vector<16x128xi1>
    %26 = vector.broadcast %cst : f32 to vector<16x128xf32>
    %27 = arith.select %25, %9, %26 : vector<16x128xi1>, vector<16x128xf32>
    %c0_1 = arith.constant 0 : index
    %c0_2 = arith.constant 0 : index
    %28 = vector.load %arg9[%c0_1, %c0_2] : memref<1x128xf32, #tpu.memory_space<vmem>>, vector<1x128xf32>
    %cst_3 = arith.constant dense<0xFF800000> : vector<128xf32>
    %29 = vector.multi_reduction <maximumf>, %27, %cst_3 [0] : vector<16x128xf32> to vector<128xf32>
    %30 = vector.shape_cast %29 : vector<128xf32> to vector<1x128xf32>
    %31 = arith.maximumf %28, %30 : vector<1x128xf32>
    %c0_4 = arith.constant 0 : index
    %c0_5 = arith.constant 0 : index
    %32 = vector.load %arg9[%c0_4, %c0_5] : memref<1x128xf32, #tpu.memory_space<vmem>>, vector<1x128xf32>
    tpu.vector_store %arg9[%c0_4, %c0_5], %31 {strides = array<i32>} : memref<1x128xf32, #tpu.memory_space<vmem>>, vector<1x128xf32>,
    %33 = arith.index_cast %arg0 : i32 to index
    %34 = memref.load %arg6[%33] : memref<4xi32, #tpu.memory_space<smem>>
    %c1_i32_6 = arith.constant 1 : i32
    %35 = arith.cmpi eq, %34, %c1_i32_6 : i32
    %36 = arith.extui %35 : i1 to i32
    %c0_i32_7 = arith.constant 0 : i32
    %37 = arith.cmpi ne, %36, %c0_i32_7 : i32
    scf.if %37 {
      %c0_8 = arith.constant 0 : index
      %c0_9 = arith.constant 0 : index
      %38 = vector.load %arg9[%c0_8, %c0_9] : memref<1x128xf32, #tpu.memory_space<vmem>>, vector<1x128xf32>
      %c0_10 = arith.constant 0 : index
      %c0_11 = arith.constant 0 : index
      %c0_12 = arith.constant 0 : index
      %39 = vector.load %arg8[%c0_10, %c0_11, %c0_12] : memref<1x1x128xf32, #tpu.memory_space<vmem>>, vector<1x1x128xf32>
      %40 = vector.shape_cast %39 : vector<1x1x128xf32> to vector<1x128xf32>
      %41 = vector.shape_cast %38 : vector<1x128xf32> to vector<1x1x128xf32>
      tpu.vector_store %arg8[%c0_10, %c0_11, %c0_12], %41 {strides = array<i32>} : memref<1x1x128xf32, #tpu.memory_space<vmem>>, vector<1x1x128xf32>,
    } else {
    }
    return
  }
  func.func @transform_0(%arg0: i32, %arg1: memref<3xi32, #tpu.memory_space<smem>>, %arg2: memref<3xi32, #tpu.memory_space<smem>>, %arg3: memref<4xi32, #tpu.memory_space<smem>>, %arg4: memref<4xi32, #tpu.memory_space<smem>>, %arg5: memref<4xi32, #tpu.memory_space<smem>>, %arg6: memref<4xi32, #tpu.memory_space<smem>>) -> (i32, i32) {
    %0 = arith.index_cast %arg0 : i32 to index
    %1 = memref.load %arg4[%0] : memref<4xi32, #tpu.memory_space<smem>>
    %c0_i32 = arith.constant 0 : i32
    %c0_i32_0 = arith.constant 0 : i32
    return %1, %c0_i32 : i32, i32
  }
  func.func @transform_1(%arg0: i32, %arg1: memref<3xi32, #tpu.memory_space<smem>>, %arg2: memref<3xi32, #tpu.memory_space<smem>>, %arg3: memref<4xi32, #tpu.memory_space<smem>>, %arg4: memref<4xi32, #tpu.memory_space<smem>>, %arg5: memref<4xi32, #tpu.memory_space<smem>>, %arg6: memref<4xi32, #tpu.memory_space<smem>>) -> (i32, i32, i32) {
    %0 = arith.index_cast %arg0 : i32 to index
    %1 = memref.load %arg3[%0] : memref<4xi32, #tpu.memory_space<smem>>
    %c0_i32 = arith.constant 0 : i32
    %c0_i32_0 = arith.constant 0 : i32
    %c0_i32_1 = arith.constant 0 : i32
    return %1, %c0_i32, %c0_i32_0 : i32, i32, i32
  }
}

</mosaic_0001>

<bundles_post_ra>
// kernel: tpu_custom_call.1
= control target key start
LH: loop header
LB: loop body
LE: loop exit
PB: predicated region body
PF: predicated region fallthrough
CT: control target
= control target key end

     0   :  { %s609_s30 = smov [#allocation4]   ;;  %s610_s8 = smov [#allocation5]   ;;  %s856_s0 = inlined_call_operand.hbm [shape: s32[3], index: 0, kind: input, shape index: {}]   ;;  %s857_s6 = inlined_call_operand.hbm [shape: f32[30,128], index: 6, kind: input, shape index: {}]   ;;  %s858_s7 = inlined_call_operand.hbm [shape: f32[3,1,128], index: 7, kind: output, shape index: {}]   ;;  %s859_s1 = inlined_call_operand.hbm [shape: s32[3], index: 1, kind: input, shape index: {}]   ;;  %s860_s2 = inlined_call_operand.vmem [shape: s32[4], index: 2, kind: input, shape index: {}]   ;;  %s861_s3 = inlined_call_operand.vmem [shape: s32[4], index: 3, kind: input, shape index: {}]   ;;  %s862_s4 = inlined_call_operand.vmem [shape: s32[4], index: 4, kind: input, shape index: {}]   ;;  %s863_s5 = inlined_call_operand.vmem [shape: s32[4], index: 5, kind: input, shape index: {}]  }
   0x1   :  { %s13_s26 = sshll.u32 %s856_s0, 4  ;;  %s18_s29 = sshll.u32 %s859_s1, 4  ;;  %s14_s26 = int_to_ptr.hbm [resolvable:$true] %s13_s26  ;;  %s19_s29 = int_to_ptr.hbm [resolvable:$true] %s18_s29 }
   0x2   :  { %16 = dma.hbm_to_smem %s14_s26, 16, %s609_s30, [#allocation3] }
   0x3   :  { %21 = dma.hbm_to_smem %s19_s29, 16, %s610_s8, [#allocation3] }
   0x4   :  { %s23_s11 = sshll.u32 %s860_s2, 4  ;;  %s28_s14 = sshll.u32 %s861_s3, 4  ;;  %s24_s11 = int_to_ptr.vmem [resolvable:$true] %s23_s11  ;;  %s29_s14 = int_to_ptr.vmem [resolvable:$true] %s28_s14 }
   0x5   :  { %s611_s0 = smov [#allocation6]   ;;  %s612_s15 = smov [#allocation7]  }
   0x6   :  { %26 = dma.vmem_to_smem %s24_s11, 16, %s611_s0, [#allocation3] }
   0x7   :  { %31 = dma.vmem_to_smem %s29_s14, 16, %s612_s15, [#allocation3] }
   0x8   :  { %s33_s17 = sshll.u32 %s862_s4, 4  ;;  %s38_s20 = sshll.u32 %s863_s5, 4  ;;  %s34_s17 = int_to_ptr.vmem [resolvable:$true] %s33_s17  ;;  %s39_s20 = int_to_ptr.vmem [resolvable:$true] %s38_s20 }
   0x9   :  { %s613_s2 = smov [#allocation8]   ;;  %s614_s21 = smov [#allocation9]  }
   0xa   :  { %36 = dma.vmem_to_smem %s34_s17, 16, %s613_s2, [#allocation3] }
   0xb   :  { %41 = dma.vmem_to_smem %s39_s20, 16, %s614_s21, [#allocation3] }
   0xc   :  { %571 = dma.done.wait [#allocation3], 96 }
   0xd   :  { %572 = vsyncadd [#allocation3], 4294967200 }
   0xe   :  { %44 = sfence }
   0xf   :  { %45 = vsyncpa [#allocation11], 0 }
  0x10   :  { %47 = vsyncpa [#allocation11 + $0x1], 0 }
  0x11   :  { %48 = vsyncpa [#allocation12], 0 }
  0x12   :  { %50 = vsyncpa [#allocation12 + $0x1], 0  ;;  %s676_s3 = smov 0   ;;  %s678_s4 = smov 0  }
  0x13   :  { %s680_s22 = smov 0   ;;  %s682_s23 = smov 0  }
  0x14   :  { %s684_s5 = smov 0   ;;  %s686_s24 = smov 0  }
  0x15   :  { %s688_s25 = smov 0  }
  0x16 LB: > { %s710_s26 = sadd.s32 4294967295, %s607_s25   ;;  %s314_s27 = sadd.s32 4294967294, %s607_s25   ;;  %s607_s25 = sphi %s688_s25, %s878_s25   ;;  %s603_s24 = sphi %s686_s24, %s877_s24   ;;  %s599_s5 = sphi %s684_s5, %s876_s5   ;;  %s595_s23 = sphi %s682_s23, %s875_s23   ;;  %s591_s22 = sphi %s680_s22, %s874_s22   ;;  %s587_s4 = sphi %s678_s4, %s873_s4   ;;  %s583_s3 = sphi %s676_s3, %s872_s3  }
  0x17   : > { %s714_s28 = sadd.s32 1, %s607_s25   ;;  %s60_s29 = sld [smem:[#allocation7 + %s607_s25]] }
  0x18   : > { %s61_s30 = sld [smem:[#allocation7 + %s714_s28]]  ;;  %s65_s8 = sadd.s32 1, %s603_s24 }
  0x19   : > { %p72_p0 = scmp.ne.s32.totalorder %s603_s24, %s599_s5  ;;  %p73_p1 = scmp.eq.s32.totalorder %s607_s25, 0 }
  0x1a   : > { %p78_p2 = scmp.ne.s32.totalorder %s599_s5, %s595_s23  ;;  %p79_p3 = scmp.eq.s32.totalorder %s710_s26, 0 }
  0x1b   : > { %p724_p4 = por %p73_p1, %p72_p0  ;;  %s88_s10 = sld [smem:[#allocation6 + %s607_s25]] }
  0x1c   : > { %p729_p5 = por %p79_p3, %p78_p2  ;;  %s89_s12 = sld [smem:[#allocation6 + %s714_s28]] }
  0x1d   : > { %s93_s13 = sadd.s32 1, %s591_s22  ;;  %p103_p6 = scmp.ne.s32.totalorder %s591_s22, %s587_s4 }
  0x1e   : > { %s62_s14 = ssub.s32 %s60_s29, %s61_s30  ;;  %p104_p7 = scmp.eq.s32.totalorder %s710_s26, 3 }
  0x1f   : > { %p63_p8 = scmp.eq.s32.totalorder %s62_s14, 0  ;;  %p109_p9 = scmp.ne.s32.totalorder %s587_s4, %s583_s3 }
  0x20   : > { %p740_p10 = por %p104_p7, %p103_p6  ;;  %p110_p11 = scmp.eq.s32.totalorder %s314_s27, 3 }
  0x21   : > { %s745_s15 = scalar_select %p63_p8, %s603_s24, %s65_s8  }
  0x22   : > { %s90_s1 = ssub.s32 %s88_s10, %s89_s12  ;;  %p747_p12 = por %p110_p11, %p109_p9 }
  0x23   : > { %867 = sst [smem:[#allocation20_spill]] %s745_s15  ;;  %p91_p13 = scmp.eq.s32.totalorder %s90_s1, 0 }
  0x24   : > { %p346_p0 = scmp.lt.s32.totalorder %s607_s25, 4  ;;  %s130_s17 = sand.u32 1, %s603_s24  }
  0x25   : > { %s754_s18 = scalar_select %p91_p13, %s591_s22, %s93_s13  }
  0x26   : > { %s317_s19 = sshll.u32 %s130_s17, 4  ;;  %p758_p1 = pnand %p346_p0, %p724_p4 }
  0x27   : > { %s328_s2 = scalar_select %p724_p4, [#allocation7], [#allocation14] }
  0x28   : > { %s329_s21 = scalar_select %p724_p4, %s607_s25, 0 }
  0x29   : > { %s880_s2 = smov (!%p346_p0, %s328_s2), [#allocation16]  ;;  %s134_s27 = scalar_lea.vmem [#allocation10], %s317_s19 }
  0x2a   : > { %s882_s21 = smov (!%p346_p0, %s329_s21), 0  ;;  %s767_s29 = sshll.u32 %s134_s27, 4  ;;  %s144_s29 = int_to_ptr.vmem [resolvable:$true] %s767_s29 }
  0x2b   : > { %s135_s23 = sld [smem:[%s880_s2 + %s882_s21]]  ;;  %p320_p2 = scmp.ge.s32.totalorder %s607_s25, 1 }
  0x2c   : > { %p151_p3 = scmp.lt.s32.totalorder %s607_s25, 5  ;;  %s131_s14 = scalar_lea.sflag [#allocation11], %s130_s17 }
  0x2d   : > { %p489_p7 = pneg %p758_p1  ;;  %s492_s27 = scalar_lea.hbm %s857_s6, 32 }
  0x2e   : > { %p771_p6 = pnand %p320_p2, %p151_p3 }
  0x31   : > { %s327_s8 = sshll.u32 %s135_s23, 4 }
  0x32   : > { %s140_s9 = scalar_lea.hbm %s857_s6, %s327_s8 }
  0x33   : > { %s141_s13 = sshll.u32 %s140_s9, 4  ;;  %s142_s13 = int_to_ptr.hbm [resolvable:$true] %s141_s13 }
  0x34   : > { %s485_s1 = sshra.s32 %s142_s13, 4  ;;  %s486_s1 = int_to_ptr.hbm [resolvable:$true] %s485_s1 }
  0x35   : > { %s487_s19 = scalar_lea.hbm %s486_s1, 16  ;;  %p493_p11 = scmp.lt.s32.totalorder %s486_s1, %s857_s6 }
  0x36   : > { %p488_p4 = scmp.ne.s32.totalorder %s486_s1, %s487_s19  ;;  %p494_p13 = scmp.lt.s32.totalorder %s492_s27, %s487_s19 }
  0x38   : > { %p490_p8 = pnand %p489_p7, %p488_p4  ;;  %p495_p0 = por %p494_p13, %p493_p11 }
  0x3a   : > { %p491_p9 = pneg %p490_p8 }
  0x3c   : > { %p496_p2 = pnand %p495_p0, %p491_p9 }
  0x3e   : > { %499 = shalt.err (!%p496_p2)
}
  0x3f   : > { %s615_s17 = smov 128   ;;  %s616_s8 = smov 8  }
  0x40   : > { %341 = dma.hbm_to_vmem [thread:$0]  (!%p758_p1), %s142_s13, 256, %s144_s29, %s131_s14, %s615_s17, %s615_s17, %s616_s8  }
  0x41   : > { %155 = sbr.rel (%p771_p6) target bundleno = 148 (0x94), region = 24  ;;  %s157_s10 = sand.u32 (!%p771_p6), 1, %s599_s5  }
  0x42   : > { %s792_s12 = sshll.u32 (!%p771_p6), %s157_s10, 4  ;;  %s158_s15 = scalar_lea.sflag (!%p771_p6), [#allocation11], %s157_s10 }
  0x43   : > { %s161_s9 = scalar_lea.vmem (!%p771_p6), [#allocation10], %s792_s12 }
  0x46   : > { %574 = dma.done.wait (%p729_p5), %s158_s15, 256  }
  0x47   : > { %576 = vsyncadd (%p729_p5), %s158_s15, 4294967040  ;;  %s178_s20 = sand.u32 1, %s587_s4   ;;  %s183_s29 = sld [smem:[#allocation6 + %s710_s26]] }
  0x48   : > { %s184_s30 = sld [smem:[#allocation7 + %s710_s26]]  ;;  %s805_s14 = scalar_lea.vmem [#allocation13], %s178_s20 }
  0x49   : > { %s185_s13 = sld [smem:[#allocation8 + %s710_s26]] }
  0x4f   : > { %p322_p1 = scmp.ne.s32.totalorder %s185_s13, 1 }
  0x51   : > { %189 = sbr.rel (%p322_p1) target bundleno = 88 (0x58), region = 32 }
  0x56   : > { %v617_v0 = vmov -inf  }
  0x57   : > { %190 = vst [vmem:[#allocation2] sm:$0x1] %v617_v0 }
  0x58 PF: > { %s323_s1 = sshll.u32 %s184_s30, 4  ;;  %v194_v1 = vlaneseq  ;;  %s200_s11 = sld [smem:[#allocation5 + %s183_s29]]  ;;  %v191_v8 = vld [vmem:[%s161_s9] sm:$0xff]  ;;  %v192_v10 = vld [vmem:[%s161_s9 + $0x8] sm:$0xff] }
  0x59   : > { %v197_v2 = vstv %s323_s1  ;;  %s201_s19 = sld [smem:[#allocation4 + %s183_s29]] }
  0x5a   : > { %v195_v3 = vshrl.u32 %v194_v1, 7  ;;  %s227_s2 = sld [smem:[#allocation9 + %s710_s26]] }
  0x5c   : > { %v196_v4 = vadd.s32 8, %v195_v3  ;;  %v198_v5 = vadd.s32 %v197_v2, %v195_v3 }
  0x5e   : > { %v199_v6 = vadd.s32 %v197_v2, %v196_v4  ;;  %v202_v7 = vstv %s200_s11  ;;  %v217_v19 = vld [vmem:[#allocation2] sm:$0x1] }
  0x5f   : > { %vm203_vm0 = vcmp.ge.s32.totalorder %v198_v5, %v202_v7  ;;  %s205_s21 = sadd.s32 %s201_s19, %s200_s11 }
  0x60   : > { %vm204_vm1 = vcmp.ge.s32.totalorder %v199_v6, %v202_v7  ;;  %v206_v9 = vstv %s205_s21  ;;  %p324_p5 = scmp.ne.s32.totalorder %s227_s2, 1 }
  0x61   : > { %vm207_vm2 = vcmp.lt.s32.totalorder %v198_v5, %v206_v9  ;;  %vm208_vm3 = vcmp.lt.s32.totalorder %v199_v6, %v206_v9 }
  0x62   : > { %vm209_vm4 = vmand %vm203_vm0, %vm207_vm2 }
  0x63   : > { %vm210_vm5 = vmand %vm204_vm1, %vm208_vm3  ;;  %v215_v11 = vsel %vm209_vm4, %v191_v8, -inf }
  0x64   : > { %v216_v12 = vsel %vm210_vm5, %v192_v10, -inf }
  0x65   : > { %v218_v13 = vmax.f32 %v215_v11, %v216_v12 }
  0x67   : > { %v219_v14 = vrot.slane %v218_v13, 4 }
  0x69   : > { %v220_v15 = vmax.f32 %v218_v13, %v219_v14 }
  0x6b   : > { %v221_v16 = vrot.slane %v220_v15, 2 }
  0x6d   : > { %v222_v17 = vmax.f32 %v220_v15, %v221_v16 }
  0x6f   : > { %v223_v18 = vrot.slane %v222_v17, 1 }
  0x71   : > { %v224_v20 = vmax.f32 %v222_v17, %v223_v18  ;;  %231 = sbr.rel (%p324_p5) target bundleno = 126 (0x7e), region = 36 }
  0x73   : > { %v225_v21 = vmax.f32 %v217_v19, %v224_v20 }
  0x75   : > { %226 = vst [vmem:[#allocation2] sm:$0x1] %v225_v21 }
  0x7c   : > { %v232_v22 = vld [vmem:[#allocation2] sm:$0x1] }
  0x7d   : > { %233 = vst [vmem:[%s805_s14] sm:$0x1] %v232_v22 }
  0x7e PF: > { %s332_s27 = scalar_select %p740_p10, [#allocation6], [#allocation15] }
  0x7f   : > { %s884_s26 = smov (!%p740_p10, %s710_s26), 0  ;;  %s246_s17 = sshll.u32 %s805_s14, 4  ;;  %s247_s17 = int_to_ptr.vmem [resolvable:$true] %s246_s17 }
  0x80   : > { %s241_s23 = sld [smem:[%s332_s27 + %s884_s26]]  ;;  %s235_s9 = scalar_lea.sflag [#allocation12], %s178_s20 }
  0x81   : > { %s535_s26 = scalar_lea.hbm %s858_s7, 3 }
  0x86   : > { %s244_s12 = scalar_lea.hbm %s858_s7, %s241_s23 }
  0x87   : > { %s248_s15 = sshll.u32 %s244_s12, 4  ;;  %s249_s15 = int_to_ptr.hbm [resolvable:$true] %s248_s15 }
  0x88   : > { %s529_s29 = sshra.s32 %s249_s15, 4  ;;  %s530_s29 = int_to_ptr.hbm [resolvable:$true] %s529_s29 }
  0x89   : > { %s531_s30 = scalar_lea.hbm %s530_s29, 1  ;;  %p536_p7 = scmp.lt.s32.totalorder %s530_s29, %s858_s7 }
  0x8a   : > { %p532_p3 = scmp.ne.s32.totalorder %s530_s29, %s531_s30  ;;  %p537_p8 = scmp.lt.s32.totalorder %s535_s26, %s531_s30 }
  0x8c   : > { %p533_p6 = pnand %p532_p3, %p740_p10  ;;  %p538_p9 = por %p537_p8, %p536_p7 }
  0x8e   : > { %p534_p4 = pneg %p533_p6 }
  0x90   : > { %p539_p11 = pnand %p538_p9, %p534_p4 }
  0x92   : > { %542 = shalt.err (!%p539_p11)
}
  0x93   : > { %334 = dma.vmem_to_hbm [thread:$0]  (%p740_p10), %s247_s17, 16, %s249_s15, %s235_s9  }
  0x94 PF: > { %p347_p13 = scmp.ge.s32.totalorder %s607_s25, 2  ;;  %s260_s20 = sand.u32 1, %s583_s3  }
  0x95   : > { %s261_s19 = scalar_lea.sflag [#allocation12], %s260_s20 }
  0x96   : > { %p343_p0 = pnand %p347_p13, %p747_p12 }
  0x98   : > { %p344_p2 = pneg %p343_p0 }
  0x9a   : > { %578 = dma.done.wait (%p344_p2), %s261_s19, 16  }
  0x9b   : > { %580 = vsyncadd (%p344_p2), %s261_s19, 4294967280  ;;  %s871_s0 = sld [smem:[#allocation20_spill]]  ;;  %p53_p10 = scmp.ge.s32.totalorder %s714_s28, 6  }
  0x9c   : > { %s872_s3 = smov %s587_s4  ;;  %s873_s4 = smov %s591_s22 }
  0x9d   : > { %s874_s22 = smov %s754_s18  ;;  %s875_s23 = smov %s599_s5 }
  0x9e   : > { %s876_s5 = smov %s603_s24  ;;  %s878_s25 = smov %s714_s28 }
  0x9f   :  { %55 = sbr.rel (!%p53_p10) target bundleno = 22 (0x16), region = 77 }
  0xa1   : > { %s877_s24 = smov %s871_s0 }
  0xa4   :  { %266 = vsyncpa [#allocation11], 1 }
  0xa5   :  { %268 = vsyncpa [#allocation11 + $0x1], 1 }
  0xa6   :  { %269 = vsyncpa [#allocation12], 1 }
  0xa7   :  { %271 = vsyncpa [#allocation12 + $0x1], 1 }

</bundles_post_ra>
